<compile_context>
chip_gen: v5e
topology: v5e:2x2
jax: 0.10.0
libtpu: 0.0.40
codegen_flags: <defaults>
</compile_context>

<pallas_src>
import functools
from typing import List, Optional

import jax
import jax.numpy as jnp
from jax.experimental import pallas as pl
from jax.experimental.pallas import tpu as pltpu

_LANE = 128     # lane width: last dim padded to a multiple of this
_SUBLANE = 8    # sublane width: batch padded to a multiple of this


def _round_up(x: int, m: int) -> int:
    return ((x + m - 1) // m) * m


# ----------------------------------------------------------------------------
# Fused kernel: the whole FCNet in one kernel body (statically unrolled).
#   refs = (x_ref, w0_ref, b0_ref, w1_ref, b1_ref, ..., o_ref)
#   x/w are bf16 (lane-dense padded), biases f32, accumulation f32.
# ----------------------------------------------------------------------------
def _fused_fcnet_kernel(*refs, num_layers: int):
    x_ref = refs[0]
    o_ref = refs[-1]

    h = x_ref[...]  # bf16 (Bpad, K0pad)
    for i in range(num_layers):
        w_ref = refs[1 + 2 * i]   # bf16 (Kpad_i, Npad_i)
        b_ref = refs[2 + 2 * i]   # f32  (1, Npad_i)
        acc = jnp.dot(h, w_ref[...], preferred_element_type=jnp.float32)
        acc = acc + b_ref[...]
        if i < num_layers - 1:
            # ReLU between linears (matches nn.Sequential[L0, ReLU, L1, ...]).
            acc = jnp.maximum(acc, 0.0)
            h = acc.astype(jnp.bfloat16)      # bf16 operands for next MXU matmul
        else:
            o_ref[...] = acc.astype(o_ref.dtype)


# ----------------------------------------------------------------------------
# Parameter construction (PyTorch nn.Linear-style init) + packing for kernel.
# ----------------------------------------------------------------------------
def init_fcnet_params(key: jax.Array, input_size: int, output_size: int,
                      hidden_sizes: Optional[List[int]] = None):
    """weight, bias ~ U(-1/sqrt(fan_in), 1/sqrt(fan_in)); weights stored as
    (in_features, out_features) so forward is y = x @ W + b."""
    hidden_sizes = [] if hidden_sizes is None else hidden_sizes
    dims = [input_size, *hidden_sizes, output_size] if hidden_sizes else [input_size, output_size]

    params = []
    for d_in, d_out in zip(dims[:-1], dims[1:]):
        key, kw, kb = jax.random.split(key, 3)
        bound = 1.0 / (d_in ** 0.5)
        w = jax.random.uniform(kw, (d_in, d_out), jnp.float32, -bound, bound)
        b = jax.random.uniform(kb, (1, d_out), jnp.float32, -bound, bound)
        params.append((w, b))
    return params


def pack_fcnet_params(params):
    """Zero-pad every layer to lane-dense (multiple-of-128) feature dims and
    cast weights to bf16 (biases stay f32; accumulation is f32 in-kernel)."""
    packed = []
    for w, b in params:
        d_in, d_out = w.shape
        kp = _round_up(d_in, _LANE)
        npad = _round_up(d_out, _LANE)
        w_p = jnp.zeros((kp, npad), jnp.bfloat16).at[:d_in, :d_out].set(
            w.astype(jnp.bfloat16))
        b_p = jnp.zeros((1, npad), jnp.float32).at[:, :d_out].set(b)
        packed.append((w_p, b_p))
    return packed


# ----------------------------------------------------------------------------
# Forward pass: one fused pallas_call.
# ----------------------------------------------------------------------------
@functools.partial(jax.jit, static_argnames=("output_size",))
def fcnet_forward(packed_params, x: jax.Array, *, output_size: int) -> jax.Array:
    batch, d_in = x.shape
    num_layers = len(packed_params)
    bp = _round_up(batch, _SUBLANE)
    k0_pad = packed_params[0][0].shape[0]
    n_out_pad = packed_params[-1][0].shape[1]

    # Lane-dense, zero-padded bf16 input slab.
    x_p = jnp.zeros((bp, k0_pad), jnp.bfloat16).at[:batch, :d_in].set(
        x.astype(jnp.bfloat16))

    flat_inputs = [x_p]
    for w, b in packed_params:
        flat_inputs += [w, b]

    # Advisory cost estimate for XLA scheduling around the custom call.
    flops = 0
    bytes_accessed = x_p.size * x_p.dtype.itemsize + bp * n_out_pad * 4
    for w, b in packed_params:
        flops += 2 * bp * w.shape[0] * w.shape[1]
        bytes_accessed += w.size * w.dtype.itemsize + b.size * b.dtype.itemsize

    kernel = functools.partial(_fused_fcnet_kernel, num_layers=num_layers)
    out_p = pl.pallas_call(
        kernel,
        out_shape=jax.ShapeDtypeStruct((bp, n_out_pad), jnp.float32),
        # Whole (tiny) operand set lives in VMEM; no grid, no per-step overhead.
        in_specs=[pl.BlockSpec(memory_space=pltpu.MemorySpace.VMEM)] * len(flat_inputs),
        out_specs=pl.BlockSpec(memory_space=pltpu.MemorySpace.VMEM),
        compiler_params=pltpu.CompilerParams(vmem_limit_bytes=32 * 1024 * 1024),
        cost_estimate=pl.CostEstimate(
            flops=flops, transcendentals=0, bytes_accessed=bytes_accessed),
    )(*flat_inputs)

    return out_p[:batch, :output_size]


# ----------------------------------------------------------------------------
# Pure-JAX references for validation.
# ----------------------------------------------------------------------------
def fcnet_reference_f32(params, x: jax.Array) -> jax.Array:
    n = len(params)
    for i, (w, b) in enumerate(params):
        x = x @ w + b
        if i < n - 1:
            x = jnp.maximum(x, 0.0)
    return x


def fcnet_reference_bf16(params, x: jax.Array) -> jax.Array:
    """Mimics the kernel numerics: bf16 matmul operands, f32 accumulation."""
    n = len(params)
    h = x.astype(jnp.bfloat16)
    out = None
    for i, (w, b) in enumerate(params):
        acc = jnp.dot(h, w.astype(jnp.bfloat16),
                      preferred_element_type=jnp.float32) + b
        if i < n - 1:
            h = jnp.maximum(acc, 0.0).astype(jnp.bfloat16)
        else:
            out = acc
    return out


if __name__ == "__main__":
    # Small shapes consistent with the module.
    batch = 8
    input_size = 32
    hidden_sizes = [64, 48]
    output_size = 16

    key = jax.random.PRNGKey(0)
    key_params, key_x = jax.random.split(key)

    params = init_fcnet_params(key_params, input_size, output_size, hidden_sizes)
    x = jax.random.normal(key_x, (batch, input_size), jnp.float32)

    packed = pack_fcnet_params(params)
    out = fcnet_forward(packed, x, output_size=output_size)
    out = jax.block_until_ready(out)

    assert out.shape == (batch, output_size), out.shape
    assert out.dtype == jnp.float32, out.dtype

    # Tight check against a reference with identical bf16-operand numerics.
    ref_bf16 = fcnet_reference_bf16(params, x)
    assert jnp.allclose(out, ref_bf16, atol=1e-4, rtol=1e-4), "mismatch vs bf16 reference"

    # Loose check against the full-f32 semantics of the PyTorch module.
    ref_f32 = fcnet_reference_f32(params, x)
    assert jnp.allclose(out, ref_f32, atol=5e-2, rtol=5e-2), "mismatch vs f32 reference"

    print("KERNEL_OK")
</pallas_src>

<mosaic_0001>
module attributes {stable_mosaic.version = 11 : i64} {
  func.func @_fused_fcnet_kernel(%arg0: memref<8x128xbf16, #tpu.memory_space<vmem>>, %arg1: memref<128x128xbf16, #tpu.memory_space<vmem>>, %arg2: memref<1x128xf32, #tpu.memory_space<vmem>>, %arg3: memref<128x128xbf16, #tpu.memory_space<vmem>>, %arg4: memref<1x128xf32, #tpu.memory_space<vmem>>, %arg5: memref<128x128xbf16, #tpu.memory_space<vmem>>, %arg6: memref<1x128xf32, #tpu.memory_space<vmem>>, %arg7: memref<8x128xf32, #tpu.memory_space<vmem>>) attributes {dimension_semantics = [], scalar_prefetch = 0 : i64, scratch_operands = 0 : i64, tpu.core_type = #tpu.core_type<tc>} {
    %c0 = arith.constant 0 : index
    %c0_0 = arith.constant 0 : index
    %0 = vector.load %arg0[%c0, %c0_0] : memref<8x128xbf16, #tpu.memory_space<vmem>>, vector<8x128xbf16>
    %c0_1 = arith.constant 0 : index
    %c0_2 = arith.constant 0 : index
    %1 = vector.load %arg1[%c0_1, %c0_2] : memref<128x128xbf16, #tpu.memory_space<vmem>>, vector<128x128xbf16>
    %cst = arith.constant dense<0.000000e+00> : vector<8x128xf32>
    %2 = tpu.matmul %0, %1, %cst {dimension_numbers = #tpu.dot_dimension_numbers<[1], [0], [0], [1], [0, 0, 1, 1], [], []>} : vector<8x128xbf16>, vector<128x128xbf16>, vector<8x128xf32> -> vector<8x128xf32>
    %c0_3 = arith.constant 0 : index
    %c0_4 = arith.constant 0 : index
    %3 = vector.load %arg2[%c0_3, %c0_4] : memref<1x128xf32, #tpu.memory_space<vmem>>, vector<1x128xf32>
    %4 = vector.broadcast %3 : vector<1x128xf32> to vector<8x128xf32>
    %5 = arith.addf %2, %4 : vector<8x128xf32>
    %cst_5 = arith.constant 0.000000e+00 : f32
    %6 = vector.broadcast %cst_5 : f32 to vector<8x128xf32>
    %7 = arith.maximumf %5, %6 : vector<8x128xf32>
    %8 = arith.truncf %7 : vector<8x128xf32> to vector<8x128xbf16>
    %c0_6 = arith.constant 0 : index
    %c0_7 = arith.constant 0 : index
    %9 = vector.load %arg3[%c0_6, %c0_7] : memref<128x128xbf16, #tpu.memory_space<vmem>>, vector<128x128xbf16>
    %cst_8 = arith.constant dense<0.000000e+00> : vector<8x128xf32>
    %10 = tpu.matmul %8, %9, %cst_8 {dimension_numbers = #tpu.dot_dimension_numbers<[1], [0], [0], [1], [0, 0, 1, 1], [], []>} : vector<8x128xbf16>, vector<128x128xbf16>, vector<8x128xf32> -> vector<8x128xf32>
    %c0_9 = arith.constant 0 : index
    %c0_10 = arith.constant 0 : index
    %11 = vector.load %arg4[%c0_9, %c0_10] : memref<1x128xf32, #tpu.memory_space<vmem>>, vector<1x128xf32>
    %12 = vector.broadcast %11 : vector<1x128xf32> to vector<8x128xf32>
    %13 = arith.addf %10, %12 : vector<8x128xf32>
    %cst_11 = arith.constant 0.000000e+00 : f32
    %14 = vector.broadcast %cst_11 : f32 to vector<8x128xf32>
    %15 = arith.maximumf %13, %14 : vector<8x128xf32>
    %16 = arith.truncf %15 : vector<8x128xf32> to vector<8x128xbf16>
    %c0_12 = arith.constant 0 : index
    %c0_13 = arith.constant 0 : index
    %17 = vector.load %arg5[%c0_12, %c0_13] : memref<128x128xbf16, #tpu.memory_space<vmem>>, vector<128x128xbf16>
    %cst_14 = arith.constant dense<0.000000e+00> : vector<8x128xf32>
    %18 = tpu.matmul %16, %17, %cst_14 {dimension_numbers = #tpu.dot_dimension_numbers<[1], [0], [0], [1], [0, 0, 1, 1], [], []>} : vector<8x128xbf16>, vector<128x128xbf16>, vector<8x128xf32> -> vector<8x128xf32>
    %c0_15 = arith.constant 0 : index
    %c0_16 = arith.constant 0 : index
    %19 = vector.load %arg6[%c0_15, %c0_16] : memref<1x128xf32, #tpu.memory_space<vmem>>, vector<1x128xf32>
    %20 = vector.broadcast %19 : vector<1x128xf32> to vector<8x128xf32>
    %21 = arith.addf %18, %20 : vector<8x128xf32>
    %c0_17 = arith.constant 0 : index
    %c0_18 = arith.constant 0 : index
    %22 = vector.load %arg7[%c0_17, %c0_18] : memref<8x128xf32, #tpu.memory_space<vmem>>, vector<8x128xf32>
    tpu.vector_store %arg7[%c0_17, %c0_18], %21 {strides = array<i32>} : memref<8x128xf32, #tpu.memory_space<vmem>>, vector<8x128xf32>,
    return
  }
}

</mosaic_0001>

<bundles_post_ra>
// kernel: fcnet_forward.1
= control target key start
LH: loop header
LB: loop body
LE: loop exit
PB: predicated region body
PF: predicated region fallthrough
CT: control target
= control target key end

     0   :  { %12 = vsyncpa [#allocation3], 0  ;;  %s642_s0 = inlined_call_operand.vmem [shape: bf16[8,128], index: 0, kind: input, shape index: {}]   ;;  %s643_s1 = inlined_call_operand.hbm [shape: bf16[128,128], index: 1, kind: input, shape index: {}]   ;;  %s644_s2 = inlined_call_operand.vmem [shape: f32[1,128], index: 2, kind: input, shape index: {}]   ;;  %s645_s3 = inlined_call_operand.hbm [shape: bf16[128,128], index: 3, kind: input, shape index: {}]   ;;  %s646_s4 = inlined_call_operand.vmem [shape: f32[1,128], index: 4, kind: input, shape index: {}]   ;;  %s647_s5 = inlined_call_operand.hbm [shape: bf16[128,128], index: 5, kind: input, shape index: {}]   ;;  %s648_s6 = inlined_call_operand.vmem [shape: f32[1,128], index: 6, kind: input, shape index: {}]   ;;  %s649_s7 = inlined_call_operand.hbm [shape: f32[8,128], index: 7, kind: output, shape index: {}]  }
   0x1   :  { %13 = vsyncpa [#allocation6], 0 }
   0x2   :  { %14 = vsyncpa [#allocation4], 0  ;;  %s36_s26 = sshll.u32 %s645_s3, 4  ;;  %s572_s27 = smov [#allocation5]   ;;  %s37_s26 = int_to_ptr.hbm [resolvable:$true] %s36_s26 }
   0x3   :  { %s38_s28 = sshll.u32 %s572_s27, 4  ;;  %s21_s8 = sshll.u32 %s643_s1, 4  ;;  %s39_s28 = int_to_ptr.vmem [resolvable:$true] %s38_s28  ;;  %s22_s8 = int_to_ptr.hbm [resolvable:$true] %s21_s8 }
   0x4   :  { %s573_s9 = smov 64   ;;  %s574_s10 = smov 4  }
   0x5   :  { %44 = dma.hbm_to_vmem [thread:$0]  %s37_s26, 1024, %s39_s28, [#allocation6], %s573_s9, %s573_s9, %s574_s10  }
   0x6   :  { %s575_s11 = smov [#allocation2]   ;;  %s51_s15 = sshll.u32 %s647_s5, 4  ;;  %s52_s15 = int_to_ptr.hbm [resolvable:$true] %s51_s15 }
   0x7   :  { %s23_s12 = sshll.u32 %s575_s11, 4  ;;  %s576_s3 = smov [#allocation7]   ;;  %s24_s12 = int_to_ptr.vmem [resolvable:$true] %s23_s12 }
   0x8   :  { %29 = dma.hbm_to_vmem [thread:$0]  %s22_s8, 1024, %s24_s12, [#allocation3], %s573_s9, %s573_s9, %s574_s10  }
   0x9   :  { %s53_s16 = sshll.u32 %s576_s3, 4  ;;  %s54_s16 = int_to_ptr.vmem [resolvable:$true] %s53_s16 }
   0xa   :  { %59 = dma.hbm_to_vmem [thread:$0]  %s52_s15, 1024, %s54_s16, [#allocation6], %s573_s9, %s573_s9, %s574_s10  }
   0xb   :  { %566 = dma.done.wait [#allocation3], 1024  }
   0xc   :  { %567 = vsyncadd [#allocation3], 4294966272 }
   0xd   :  { %568 = dma.done.wait [#allocation6], 2048  }
   0xe   :  { %569 = vsyncadd [#allocation6], 4294965248  ;;  %v444_v0 = vld [vmem:[#allocation2 + $0x38] sm:$0xff]  ;;  %v443_v1 = vld [vmem:[#allocation2 + $0x30] sm:$0xff]  ;;  %s577_s21 = smov [#allocation8]   ;;  %s330_s25 = sshll.u32 %s649_s7, 4  ;;  %s331_s25 = int_to_ptr.hbm [resolvable:$true] %s330_s25 }
   0xf   :  { %143 = vmatpush.bf16.msra.mxu0 %v444_v0  ;;  %v452_v2 = vld [vmem:[#allocation5 + $0x38] sm:$0xff]  ;;  %v451_v3 = vld [vmem:[#allocation5 + $0x30] sm:$0xff]  ;;  %v442_v4 = vld [vmem:[#allocation2 + $0x28] sm:$0xff]  ;;  %s328_s22 = sshll.u32 %s577_s21, 4  ;;  %s329_s22 = int_to_ptr.vmem [resolvable:$true] %s328_s22 }
  0x10   :  { %226 = vmatpush.bf16.msra.mxu1 %v452_v2  ;;  %v450_v5 = vld [vmem:[#allocation5 + $0x28] sm:$0xff]  ;;  %v441_v6 = vld [vmem:[#allocation2 + $0x20] sm:$0xff]  ;;  %v440_v8 = vld [vmem:[#allocation2 + $0x18] sm:$0xff] }
  0x11   :  { %v449_v7 = vld [vmem:[#allocation5 + $0x20] sm:$0xff]  ;;  %v448_v9 = vld [vmem:[#allocation5 + $0x18] sm:$0xff]  ;;  %v439_v10 = vld [vmem:[#allocation2 + $0x10] sm:$0xff] }
  0x12   :  { %v447_v11 = vld [vmem:[#allocation5 + $0x10] sm:$0xff]  ;;  %v438_v12 = vld [vmem:[#allocation2 + $0x8] sm:$0xff]  ;;  %v437_v13 = vld [vmem:[#allocation2] sm:$0xff] }
  0x13   :  { %144 = vmatpush.bf16.msra.mxu0 %v443_v1  ;;  %v74_v14 = vld [vmem:[%s642_s0] sm:$0xf]  ;;  %v446_v15 = vld [vmem:[#allocation5 + $0x8] sm:$0xff]  ;;  %v460_v17 = vld [vmem:[#allocation7 + $0x38] sm:$0xff] }
  0x14   :  { %227 = vmatpush.bf16.msra.mxu1 %v451_v3  ;;  %v445_v16 = vld [vmem:[#allocation5] sm:$0xff]  ;;  %309 = vmatpush.bf16.msra.mxu2 %v460_v17  ;;  %v459_v18 = vld [vmem:[#allocation7 + $0x30] sm:$0xff]  ;;  %v458_v19 = vld [vmem:[#allocation7 + $0x28] sm:$0xff] }
  0x15   :  { %v457_v20 = vld [vmem:[#allocation7 + $0x20] sm:$0xff]  ;;  %v456_v21 = vld [vmem:[#allocation7 + $0x18] sm:$0xff]  ;;  %v455_v22 = vld [vmem:[#allocation7 + $0x10] sm:$0xff] }
  0x16   :  { %v467_v23 = vld [vmem:[%s644_s2] ss:$0 sm:$0xff]  ;;  %v454_v29 = vld [vmem:[#allocation7 + $0x8] sm:$0xff] }
  0x17   :  { %145 = vmatpush.bf16.msra.mxu0 %v442_v4  ;;  %v453_v30 = vld [vmem:[#allocation7] sm:$0xff] }
  0x18   :  { %228 = vmatpush.bf16.msra.mxu1 %v450_v5  ;;  %310 = vmatpush.bf16.msra.mxu2 %v459_v18  ;;  %v468_v31 = vld [vmem:[%s646_s4] ss:$0 sm:$0xff] }
  0x19   :  { %v469_v37 = vld [vmem:[%s648_s6] ss:$0 sm:$0xff] }
  0x1b   :  { %146 = vmatpush.bf16.msra.mxu0 %v441_v6 }
  0x1c   :  { %229 = vmatpush.bf16.msra.mxu1 %v449_v7  ;;  %311 = vmatpush.bf16.msra.mxu2 %v458_v19 }
  0x1f   :  { %147 = vmatpush.bf16.msra.mxu0 %v440_v8 }
  0x20   :  { %230 = vmatpush.bf16.msra.mxu1 %v448_v9  ;;  %312 = vmatpush.bf16.msra.mxu2 %v457_v20 }
  0x23   :  { %148 = vmatpush.bf16.msra.mxu0 %v439_v10 }
  0x24   :  { %231 = vmatpush.bf16.msra.mxu1 %v447_v11  ;;  %313 = vmatpush.bf16.msra.mxu2 %v456_v21 }
  0x27   :  { %149 = vmatpush.bf16.msra.mxu0 %v438_v12 }
  0x28   :  { %232 = vmatpush.bf16.msra.mxu1 %v446_v15  ;;  %314 = vmatpush.bf16.msra.mxu2 %v455_v22 }
  0x2b   :  { %150 = vmatpush.bf16.msra.mxu0 %v437_v13 }
  0x2c   :  { %233 = vmatpush.bf16.msra.mxu1 %v445_v16  ;;  %315 = vmatpush.bf16.msra.mxu2 %v454_v29 }
  0x2e   :  { %151 = vmatmul.bf16.vlgmr.msra.gmra.mxu0 %v74_v14 }
  0x30   :  { %316 = vmatpush.bf16.msra.mxu2 %v453_v30 }
  0xab   :  { %v152_v24 = vpop.f32.mrf.mxu0 }
  0xac   :  { %v153_v25 = vadd.f32 %v467_v23, %v152_v24 }
  0xae   :  { %v156_v26 = vmax.f32 %v153_v25, 0.0 }
  0xb0   :  { %v157_v27 = vpack.c.bf16 %v156_v26, %v156_v26 }
  0xb2   :  { %234 = vmatmul.bf16.vlgmr.msra.gmra.mxu1 %v157_v27 }
  0xb3   :  { %v154_v28 = vpop.f32.mrf.mxu0 }
 0x12f   :  { %v235_v32 = vpop.f32.mrf.mxu1 }
 0x130   :  { %v236_v33 = vadd.f32 %v468_v31, %v235_v32 }
 0x132   :  { %v239_v34 = vmax.f32 %v236_v33, 0.0 }
 0x134   :  { %v240_v35 = vpack.c.bf16 %v239_v34, %v239_v34 }
 0x136   :  { %317 = vmatmul.bf16.vlgmr.msra.gmra.mxu2 %v240_v35 }
 0x137   :  { %v237_v36 = vpop.f32.mrf.mxu1 }
 0x1b9   :  { %v318_v38 = vpop.f32.mrf.mxu2 }
 0x1ba   :  { %v319_v39 = vadd.f32 %v469_v37, %v318_v38 }
 0x1bc   :  { %322 = vst [vmem:[#allocation8] sm:$0xff] %v319_v39 }
 0x1bd   :  { %333 = dma.vmem_to_hbm [thread:$0]  %s329_s22, 128, %s331_s25, [#allocation4]  }
 0x1c1   :  { %v320_v40 = vpop.f32.mrf.mxu2 }
 0x1c2   :  { %570 = dma.done.wait [#allocation4], 128  }
 0x1c3   :  { %571 = vsyncadd [#allocation4], 4294967168 }
 0x1c4   :  { %338 = vsyncpa [#allocation3], 1 }
 0x1c5   :  { %339 = vsyncpa [#allocation6], 1 }
 0x1c6   :  { %340 = vsyncpa [#allocation4], 1 }

</bundles_post_ra>
